<compile_context>
chip_gen: v7x
topology: tpu7x:2x2x1
jax: 0.10.0
libtpu: 0.0.40
codegen_flags: <defaults>
</compile_context>

<pallas_src>
import math

import jax
import jax.numpy as jnp
from jax import lax
from jax.experimental import pallas as pl
from jax.experimental.pallas import tpu as pltpu  # noqa: F401  (TPU backend)

# Small-shape configuration consistent with the module (d_model divisible by n_head).
SEQ_LEN = 8
BATCH = 2
D_MODEL = 32
N_HEAD = 4
HEAD_DIM = D_MODEL // N_HEAD
D_FF = 4 * D_MODEL
NK = SEQ_LEN * BATCH          # rows per half == key rows (dif)         = 16
NQ = 2 * NK                   # query rows (both cross() halves)        = 32
HNQ = N_HEAD * NQ             # head-stacked query rows                 = 128
LN_EPS = 1e-5
NEG_INF = -1e30
USE_APPROX_RECIPROCAL = True  # exact-divide fallback if tighter parity needed


def _layernorm(x, gamma, beta):
    mean = jnp.mean(x, axis=-1, keepdims=True)
    var = jnp.mean((x - mean) ** 2, axis=-1, keepdims=True)
    return (x - mean) * lax.rsqrt(var + LN_EPS) * gamma + beta


def _gelu_exact(x):
    # nn.GELU() default: exact erf-based GELU.
    return 0.5 * x * (1.0 + lax.erf(x / math.sqrt(2.0)))


def cross_kernel(x1_ref, x2_ref, wqkv_ref, wo_ref, w1_ref, w2_ref,
                 bvec_ref, bf1_ref, hmask_ref, sbias_ref, o1_ref, o2_ref):
    """Single invocation: both cross() calls, all batches, all heads at once."""
    f32 = jnp.float32
    x1 = x1_ref[...]                                   # (NK, D) rows = (l, b)
    x2 = x2_ref[...]                                   # (NK, D)
    dif = x2 - x1                                      # in-kernel subtract (VPU)
    x = jnp.concatenate([x1, x2], axis=0)              # (NQ, D) both halves

    bq = bvec_ref[0:1, :]
    bk = bvec_ref[1:2, :]
    bv = bvec_ref[2:3, :]
    bo = bvec_ref[3:4, :]
    g1 = bvec_ref[4:5, :]
    be1 = bvec_ref[5:6, :]
    g2 = bvec_ref[6:7, :]
    be2 = bvec_ref[7:8, :]
    bf2 = bvec_ref[8:9, :]

    # --- fused Q/K/V projection: one MXU push (scale folded into Wq/bq) ------
    xin = jnp.concatenate([x, dif], axis=0)            # (NQ + NK, D) = (48, 32)
    qkv = jnp.dot(xin, wqkv_ref[...], preferred_element_type=f32)   # (48, 128)
    q = qkv[0:NQ, 0:D_MODEL] + bq                      # (32, 32), pre-scaled
    k = qkv[NQ:NQ + NK, D_MODEL:2 * D_MODEL] + bk      # (16, 32)
    v = qkv[NQ:NQ + NK, 2 * D_MODEL:3 * D_MODEL] + bv  # (16, 32)

    # --- multi-head attention, heads stacked along sublanes ------------------
    # hmask keeps only head h's lanes in block h; sbias is the precomputed
    # 0 / -1e30 cross-item (batch) mask. Both are compile-time constants
    # built once on the host and DMA'd in (no iota/cmp/select in-kernel).
    hmask = hmask_ref[...]                             # (HNQ, D)
    q_stack = jnp.concatenate([q] * N_HEAD, axis=0) * hmask          # (128, 32)
    scores = lax.dot_general(q_stack, k, (((1,), (1,)), ((), ())),
                             preferred_element_type=f32)             # (128, 16)
    scores = scores + sbias_ref[...]

    scores = scores - jnp.max(scores, axis=-1, keepdims=True)
    p = jnp.exp(scores)
    denom = jnp.sum(p, axis=-1, keepdims=True)
    if USE_APPROX_RECIPROCAL:
        p = p * pl.reciprocal(denom, approx=True)      # EUP slot
    else:
        p = p / denom

    # PV for all heads at once; fold head blocks back with sublane slices.
    o_stack = jnp.dot(p, v, preferred_element_type=f32) * hmask      # (128, 32)
    attn = o_stack[0:NQ, :]
    for h in range(1, N_HEAD):                         # static unroll
        attn = attn + o_stack[h * NQ:(h + 1) * NQ, :]
    attn = jnp.dot(attn, wo_ref[...], preferred_element_type=f32) + bo

    # --- residual + norm1 -----------------------------------------------------
    out = _layernorm(x + attn, g1, be1)

    # --- feed-forward: linear1 -> GELU -> linear2 -----------------------------
    h1 = jnp.dot(out, w1_ref[...], preferred_element_type=f32) + bf1_ref[...]
    h1 = _gelu_exact(h1)
    ff = jnp.dot(h1, w2_ref[...], preferred_element_type=f32) + bf2

    # --- residual + norm2 -----------------------------------------------------
    out = _layernorm(out + ff, g2, be2)
    o1_ref[...] = out[0:NK, :].astype(o1_ref.dtype)
    o2_ref[...] = out[NK:NQ, :].astype(o2_ref.dtype)


def pack_params(params):
    """ONE-TIME packing of parameters + static masks (hoisted off the call path)."""
    scale = 1.0 / math.sqrt(HEAD_DIM)
    # Fused QKV weight (attention scale folded into Wq), padded to 128 lanes.
    wqkv = jnp.concatenate(
        [params["wq_t"] * scale, params["wk_t"], params["wv_t"],
         jnp.zeros((D_MODEL, D_MODEL), jnp.float32)], axis=1)        # (32, 128)
    bvec = jnp.concatenate(
        [params["bq"] * scale, params["bk"], params["bv"], params["bo"],
         params["g1"], params["be1"], params["g2"], params["be2"],
         params["bf2"]], axis=0)                                      # (9, 32)

    # Static masks. Row ordering of the flattened activations is l-major,
    # b-minor (free row-major reshape of (L, B, D)); the two cross() halves
    # are stacked along sublanes, then replicated per head.
    srow = jnp.arange(HNQ)
    lane = jnp.arange(D_MODEL)
    hmask = (srow[:, None] // NQ == lane[None, :] // HEAD_DIM).astype(jnp.float32)
    kcol = jnp.arange(NK)
    b_q = ((srow % NQ) % NK) % BATCH
    b_k = kcol % BATCH
    sbias = jnp.where(b_q[:, None] == b_k[None, :], 0.0, NEG_INF).astype(jnp.float32)

    return {"wqkv": wqkv, "wo": params["wo_t"], "w1": params["w1_t"],
            "w2": params["w2_t"], "bvec": bvec, "bf1": params["bf1"],
            "hmask": hmask, "sbias": sbias}


@jax.jit
def cross_transformer_forward(input1, input2, packed):
    """input1, input2: (L, B, D) as in the PyTorch module. Returns (out1, out2)."""
    L, B, D = input1.shape
    o1, o2 = pl.pallas_call(
        cross_kernel,
        out_shape=(jax.ShapeDtypeStruct((L * B, D), jnp.float32),
                   jax.ShapeDtypeStruct((L * B, D), jnp.float32)),
    )(input1.reshape(L * B, D), input2.reshape(L * B, D),
      packed["wqkv"], packed["wo"], packed["w1"], packed["w2"],
      packed["bvec"], packed["bf1"], packed["hmask"], packed["sbias"])
    return o1.reshape(L, B, D), o2.reshape(L, B, D)


# --------------------------- pure-JAX reference ------------------------------

def _mha_ref(x, dif, p):
    N, L, D = x.shape
    q = x @ p["wq_t"] + p["bq"]
    k = dif @ p["wk_t"] + p["bk"]
    v = dif @ p["wv_t"] + p["bv"]
    q = q.reshape(N, L, N_HEAD, HEAD_DIM)
    k = k.reshape(N, L, N_HEAD, HEAD_DIM)
    v = v.reshape(N, L, N_HEAD, HEAD_DIM)
    scores = jnp.einsum("nqhd,nkhd->nhqk", q, k) / math.sqrt(HEAD_DIM)
    pr = jax.nn.softmax(scores, axis=-1)
    o = jnp.einsum("nhqk,nkhd->nqhd", pr, v).reshape(N, L, D)
    return o @ p["wo_t"] + p["bo"]


def cross_ref(x, dif, p):
    attn = _mha_ref(x, dif, p)
    out = _layernorm(x + attn, p["g1"], p["be1"])
    h1 = out @ p["w1_t"] + p["bf1"]
    h1 = _gelu_exact(h1)
    ff = h1 @ p["w2_t"] + p["bf2"]
    return _layernorm(out + ff, p["g2"], p["be2"])


# --------------------------------- main ---------------------------------------

def make_params(key):
    ks = jax.random.split(key, 8)
    scale = 0.05
    return {
        # attention projections (stored transposed: x @ W_t == x @ W.T in torch)
        "wq_t": scale * jax.random.normal(ks[0], (D_MODEL, D_MODEL), jnp.float32),
        "wk_t": scale * jax.random.normal(ks[1], (D_MODEL, D_MODEL), jnp.float32),
        "wv_t": scale * jax.random.normal(ks[2], (D_MODEL, D_MODEL), jnp.float32),
        "bq": 0.01 * jnp.ones((1, D_MODEL), jnp.float32),
        "bk": 0.02 * jnp.ones((1, D_MODEL), jnp.float32),
        "bv": 0.03 * jnp.ones((1, D_MODEL), jnp.float32),
        "wo_t": scale * jax.random.normal(ks[3], (D_MODEL, D_MODEL), jnp.float32),
        "bo": 0.01 * jnp.ones((1, D_MODEL), jnp.float32),
        # layer norms
        "g1": jnp.ones((1, D_MODEL), jnp.float32),
        "be1": jnp.zeros((1, D_MODEL), jnp.float32),
        "g2": jnp.ones((1, D_MODEL), jnp.float32),
        "be2": jnp.zeros((1, D_MODEL), jnp.float32),
        # feed-forward
        "w1_t": scale * jax.random.normal(ks[4], (D_MODEL, D_FF), jnp.float32),
        "bf1": 0.01 * jnp.ones((1, D_FF), jnp.float32),
        "w2_t": scale * jax.random.normal(ks[5], (D_FF, D_MODEL), jnp.float32),
        "bf2": 0.01 * jnp.ones((1, D_MODEL), jnp.float32),
    }


if __name__ == "__main__":
    key = jax.random.PRNGKey(0)
    k1, k2, kp = jax.random.split(key, 3)

    # PyTorch-convention inputs: (seq, batch, d_model)
    input1 = jax.random.normal(k1, (SEQ_LEN, BATCH, D_MODEL), jnp.float32)
    input2 = jax.random.normal(k2, (SEQ_LEN, BATCH, D_MODEL), jnp.float32)
    params = make_params(kp)
    packed = pack_params(params)        # packed ONCE, reused every call

    out1, out2 = cross_transformer_forward(input1, input2, packed)
    jax.block_until_ready((out1, out2))

    # Correctness check against a pure-JAX reference of the same semantics.
    dif = input2 - input1
    x1_nld = jnp.transpose(input1, (1, 0, 2))
    x2_nld = jnp.transpose(input2, (1, 0, 2))
    dif_nld = jnp.transpose(dif, (1, 0, 2))
    ref1 = jnp.transpose(cross_ref(x1_nld, dif_nld, params), (1, 0, 2))
    ref2 = jnp.transpose(cross_ref(x2_nld, dif_nld, params), (1, 0, 2))

    assert out1.shape == (SEQ_LEN, BATCH, D_MODEL)
    assert out2.shape == (SEQ_LEN, BATCH, D_MODEL)
    assert jnp.allclose(out1, ref1, rtol=3e-3, atol=3e-3)
    assert jnp.allclose(out2, ref2, rtol=3e-3, atol=3e-3)

    print("KERNEL_OK")
</pallas_src>

<mosaic_0001>
module attributes {stable_mosaic.version = 11 : i64} {
  func.func @cross_kernel(%arg0: memref<16x32xf32, #tpu.memory_space<vmem>>, %arg1: memref<16x32xf32, #tpu.memory_space<vmem>>, %arg2: memref<32x128xf32, #tpu.memory_space<vmem>>, %arg3: memref<32x32xf32, #tpu.memory_space<vmem>>, %arg4: memref<32x128xf32, #tpu.memory_space<vmem>>, %arg5: memref<128x32xf32, #tpu.memory_space<vmem>>, %arg6: memref<9x32xf32, #tpu.memory_space<vmem>>, %arg7: memref<1x128xf32, #tpu.memory_space<vmem>>, %arg8: memref<128x32xf32, #tpu.memory_space<vmem>>, %arg9: memref<128x16xf32, #tpu.memory_space<vmem>>, %arg10: memref<16x32xf32, #tpu.memory_space<vmem>>, %arg11: memref<16x32xf32, #tpu.memory_space<vmem>>) attributes {dimension_semantics = [], scalar_prefetch = 0 : i64, scratch_operands = 0 : i64, tpu.core_type = #tpu.core_type<tc>} {
    %c0 = arith.constant 0 : index
    %c0_0 = arith.constant 0 : index
    %0 = vector.load %arg0[%c0, %c0_0] : memref<16x32xf32, #tpu.memory_space<vmem>>, vector<16x32xf32>
    %c0_1 = arith.constant 0 : index
    %c0_2 = arith.constant 0 : index
    %1 = vector.load %arg1[%c0_1, %c0_2] : memref<16x32xf32, #tpu.memory_space<vmem>>, vector<16x32xf32>
    %2 = arith.subf %1, %0 : vector<16x32xf32>
    %3 = tpu.concatenate %0, %1 in 0 : vector<16x32xf32>, vector<16x32xf32> -> vector<32x32xf32>
    %c0_3 = arith.constant 0 : index
    %c0_4 = arith.constant 0 : index
    %4 = vector.load %arg6[%c0_3, %c0_4] : memref<9x32xf32, #tpu.memory_space<vmem>>, vector<1x32xf32>
    %c1 = arith.constant 1 : index
    %c0_5 = arith.constant 0 : index
    %5 = vector.load %arg6[%c1, %c0_5] : memref<9x32xf32, #tpu.memory_space<vmem>>, vector<1x32xf32>
    %c2 = arith.constant 2 : index
    %c0_6 = arith.constant 0 : index
    %6 = vector.load %arg6[%c2, %c0_6] : memref<9x32xf32, #tpu.memory_space<vmem>>, vector<1x32xf32>
    %c3 = arith.constant 3 : index
    %c0_7 = arith.constant 0 : index
    %7 = vector.load %arg6[%c3, %c0_7] : memref<9x32xf32, #tpu.memory_space<vmem>>, vector<1x32xf32>
    %c4 = arith.constant 4 : index
    %c0_8 = arith.constant 0 : index
    %8 = vector.load %arg6[%c4, %c0_8] : memref<9x32xf32, #tpu.memory_space<vmem>>, vector<1x32xf32>
    %c5 = arith.constant 5 : index
    %c0_9 = arith.constant 0 : index
    %9 = vector.load %arg6[%c5, %c0_9] : memref<9x32xf32, #tpu.memory_space<vmem>>, vector<1x32xf32>
    %c6 = arith.constant 6 : index
    %c0_10 = arith.constant 0 : index
    %10 = vector.load %arg6[%c6, %c0_10] : memref<9x32xf32, #tpu.memory_space<vmem>>, vector<1x32xf32>
    %c7 = arith.constant 7 : index
    %c0_11 = arith.constant 0 : index
    %11 = vector.load %arg6[%c7, %c0_11] : memref<9x32xf32, #tpu.memory_space<vmem>>, vector<1x32xf32>
    %c8 = arith.constant 8 : index
    %c0_12 = arith.constant 0 : index
    %12 = vector.load %arg6[%c8, %c0_12] : memref<9x32xf32, #tpu.memory_space<vmem>>, vector<1x32xf32>
    %13 = tpu.concatenate %3, %2 in 0 : vector<32x32xf32>, vector<16x32xf32> -> vector<48x32xf32>
    %c0_13 = arith.constant 0 : index
    %c0_14 = arith.constant 0 : index
    %14 = vector.load %arg2[%c0_13, %c0_14] : memref<32x128xf32, #tpu.memory_space<vmem>>, vector<32x128xf32>
    %cst = arith.constant dense<0.000000e+00> : vector<48x128xf32>
    %15 = tpu.matmul %13, %14, %cst {dimension_numbers = #tpu.dot_dimension_numbers<[1], [0], [0], [1], [0, 0, 1, 1], [], []>} : vector<48x32xf32>, vector<32x128xf32>, vector<48x128xf32> -> vector<48x128xf32>
    %16 = vector.extract_strided_slice %15 {offsets = [0, 0], sizes = [32, 32], strides = [1, 1]} : vector<48x128xf32> to vector<32x32xf32>
    %17 = vector.broadcast %4 : vector<1x32xf32> to vector<32x32xf32>
    %18 = arith.addf %16, %17 : vector<32x32xf32>
    %19 = vector.extract_strided_slice %15 {offsets = [32, 32], sizes = [16, 32], strides = [1, 1]} : vector<48x128xf32> to vector<16x32xf32>
    %20 = vector.broadcast %5 : vector<1x32xf32> to vector<16x32xf32>
    %21 = arith.addf %19, %20 : vector<16x32xf32>
    %22 = vector.extract_strided_slice %15 {offsets = [32, 64], sizes = [16, 32], strides = [1, 1]} : vector<48x128xf32> to vector<16x32xf32>
    %23 = vector.broadcast %6 : vector<1x32xf32> to vector<16x32xf32>
    %24 = arith.addf %22, %23 : vector<16x32xf32>
    %c0_15 = arith.constant 0 : index
    %c0_16 = arith.constant 0 : index
    %25 = vector.load %arg8[%c0_15, %c0_16] : memref<128x32xf32, #tpu.memory_space<vmem>>, vector<128x32xf32>
    %26 = tpu.concatenate %18, %18, %18, %18 in 0 : vector<32x32xf32>, vector<32x32xf32>, vector<32x32xf32>, vector<32x32xf32> -> vector<128x32xf32>
    %27 = arith.mulf %26, %25 : vector<128x32xf32>
    %cst_17 = arith.constant dense<0.000000e+00> : vector<128x16xf32>
    %28 = tpu.matmul %27, %21, %cst_17 {dimension_numbers = #tpu.dot_dimension_numbers<[1], [1], [0], [0], [0, 0, 1, 0], [], []>} : vector<128x32xf32>, vector<16x32xf32>, vector<128x16xf32> -> vector<128x16xf32>
    %c0_18 = arith.constant 0 : index
    %c0_19 = arith.constant 0 : index
    %29 = vector.load %arg9[%c0_18, %c0_19] : memref<128x16xf32, #tpu.memory_space<vmem>>, vector<128x16xf32>
    %30 = arith.addf %28, %29 : vector<128x16xf32>
    %cst_20 = arith.constant dense<0xFF800000> : vector<128xf32>
    %31 = vector.multi_reduction <maximumf>, %30, %cst_20 [1] : vector<128x16xf32> to vector<128xf32>
    %32 = vector.shape_cast %31 : vector<128xf32> to vector<128x1xf32>
    %33 = vector.broadcast %32 : vector<128x1xf32> to vector<128x16xf32>
    %34 = arith.subf %30, %33 : vector<128x16xf32>
    %35 = math.exp %34 : vector<128x16xf32>
    %cst_21 = arith.constant dense<0.000000e+00> : vector<128xf32>
    %36 = vector.multi_reduction <add>, %35, %cst_21 [1] : vector<128x16xf32> to vector<128xf32>
    %37 = vector.shape_cast %36 : vector<128xf32> to vector<128x1xf32>
    %38 = tpu.reciprocal %37 {approx = true} : vector<128x1xf32> -> vector<128x1xf32>
    %39 = vector.broadcast %38 : vector<128x1xf32> to vector<128x16xf32>
    %40 = arith.mulf %35, %39 : vector<128x16xf32>
    %cst_22 = arith.constant dense<0.000000e+00> : vector<128x32xf32>
    %41 = tpu.matmul %40, %24, %cst_22 {dimension_numbers = #tpu.dot_dimension_numbers<[1], [0], [0], [1], [0, 0, 1, 1], [], []>} : vector<128x16xf32>, vector<16x32xf32>, vector<128x32xf32> -> vector<128x32xf32>
    %42 = arith.mulf %41, %25 : vector<128x32xf32>
    %43 = vector.extract_strided_slice %42 {offsets = [0, 0], sizes = [32, 32], strides = [1, 1]} : vector<128x32xf32> to vector<32x32xf32>
    %44 = vector.extract_strided_slice %42 {offsets = [32, 0], sizes = [32, 32], strides = [1, 1]} : vector<128x32xf32> to vector<32x32xf32>
    %45 = arith.addf %43, %44 : vector<32x32xf32>
    %46 = vector.extract_strided_slice %42 {offsets = [64, 0], sizes = [32, 32], strides = [1, 1]} : vector<128x32xf32> to vector<32x32xf32>
    %47 = arith.addf %45, %46 : vector<32x32xf32>
    %48 = vector.extract_strided_slice %42 {offsets = [96, 0], sizes = [32, 32], strides = [1, 1]} : vector<128x32xf32> to vector<32x32xf32>
    %49 = arith.addf %47, %48 : vector<32x32xf32>
    %c0_23 = arith.constant 0 : index
    %c0_24 = arith.constant 0 : index
    %50 = vector.load %arg3[%c0_23, %c0_24] : memref<32x32xf32, #tpu.memory_space<vmem>>, vector<32x32xf32>
    %cst_25 = arith.constant dense<0.000000e+00> : vector<32x32xf32>
    %51 = tpu.matmul %49, %50, %cst_25 {dimension_numbers = #tpu.dot_dimension_numbers<[1], [0], [0], [1], [0, 0, 1, 1], [], []>} : vector<32x32xf32>, vector<32x32xf32>, vector<32x32xf32> -> vector<32x32xf32>
    %52 = vector.broadcast %7 : vector<1x32xf32> to vector<32x32xf32>
    %53 = arith.addf %51, %52 : vector<32x32xf32>
    %54 = arith.addf %3, %53 : vector<32x32xf32>
    %cst_26 = arith.constant dense<0.000000e+00> : vector<32xf32>
    %55 = vector.multi_reduction <add>, %54, %cst_26 [1] : vector<32x32xf32> to vector<32xf32>
    %56 = vector.shape_cast %55 : vector<32xf32> to vector<32x1xf32>
    %cst_27 = arith.constant 3.200000e+01 : f32
    %57 = vector.broadcast %cst_27 : f32 to vector<32x1xf32>
    %58 = arith.divf %56, %57 : vector<32x1xf32>
    %59 = vector.broadcast %58 : vector<32x1xf32> to vector<32x32xf32>
    %60 = arith.subf %54, %59 : vector<32x32xf32>
    %61 = arith.mulf %60, %60 : vector<32x32xf32>
    %cst_28 = arith.constant dense<0.000000e+00> : vector<32xf32>
    %62 = vector.multi_reduction <add>, %61, %cst_28 [1] : vector<32x32xf32> to vector<32xf32>
    %63 = vector.shape_cast %62 : vector<32xf32> to vector<32x1xf32>
    %cst_29 = arith.constant 3.200000e+01 : f32
    %64 = vector.broadcast %cst_29 : f32 to vector<32x1xf32>
    %65 = arith.divf %63, %64 : vector<32x1xf32>
    %66 = vector.broadcast %58 : vector<32x1xf32> to vector<32x32xf32>
    %67 = arith.subf %54, %66 : vector<32x32xf32>
    %cst_30 = arith.constant 9.99999974E-6 : f32
    %68 = vector.broadcast %cst_30 : f32 to vector<32x1xf32>
    %69 = arith.addf %65, %68 : vector<32x1xf32>
    %70 = math.rsqrt %69 : vector<32x1xf32>
    %71 = vector.broadcast %70 : vector<32x1xf32> to vector<32x32xf32>
    %72 = arith.mulf %67, %71 : vector<32x32xf32>
    %73 = vector.broadcast %8 : vector<1x32xf32> to vector<32x32xf32>
    %74 = arith.mulf %72, %73 : vector<32x32xf32>
    %75 = vector.broadcast %9 : vector<1x32xf32> to vector<32x32xf32>
    %76 = arith.addf %74, %75 : vector<32x32xf32>
    %c0_31 = arith.constant 0 : index
    %c0_32 = arith.constant 0 : index
    %77 = vector.load %arg4[%c0_31, %c0_32] : memref<32x128xf32, #tpu.memory_space<vmem>>, vector<32x128xf32>
    %cst_33 = arith.constant dense<0.000000e+00> : vector<32x128xf32>
    %78 = tpu.matmul %76, %77, %cst_33 {dimension_numbers = #tpu.dot_dimension_numbers<[1], [0], [0], [1], [0, 0, 1, 1], [], []>} : vector<32x32xf32>, vector<32x128xf32>, vector<32x128xf32> -> vector<32x128xf32>
    %c0_34 = arith.constant 0 : index
    %c0_35 = arith.constant 0 : index
    %79 = vector.load %arg7[%c0_34, %c0_35] : memref<1x128xf32, #tpu.memory_space<vmem>>, vector<1x128xf32>
    %80 = vector.broadcast %79 : vector<1x128xf32> to vector<32x128xf32>
    %81 = arith.addf %78, %80 : vector<32x128xf32>
    %cst_36 = arith.constant 5.000000e-01 : f32
    %82 = vector.broadcast %cst_36 : f32 to vector<32x128xf32>
    %83 = arith.mulf %82, %81 : vector<32x128xf32>
    %cst_37 = arith.constant 1.41421354 : f32
    %84 = vector.broadcast %cst_37 : f32 to vector<32x128xf32>
    %85 = arith.divf %81, %84 : vector<32x128xf32>
    %86 = math.erf %85 : vector<32x128xf32>
    %cst_38 = arith.constant 1.000000e+00 : f32
    %87 = vector.broadcast %cst_38 : f32 to vector<32x128xf32>
    %88 = arith.addf %87, %86 : vector<32x128xf32>
    %89 = arith.mulf %83, %88 : vector<32x128xf32>
    %c0_39 = arith.constant 0 : index
    %c0_40 = arith.constant 0 : index
    %90 = vector.load %arg5[%c0_39, %c0_40] : memref<128x32xf32, #tpu.memory_space<vmem>>, vector<128x32xf32>
    %cst_41 = arith.constant dense<0.000000e+00> : vector<32x32xf32>
    %91 = tpu.matmul %89, %90, %cst_41 {dimension_numbers = #tpu.dot_dimension_numbers<[1], [0], [0], [1], [0, 0, 1, 1], [], []>} : vector<32x128xf32>, vector<128x32xf32>, vector<32x32xf32> -> vector<32x32xf32>
    %92 = vector.broadcast %12 : vector<1x32xf32> to vector<32x32xf32>
    %93 = arith.addf %91, %92 : vector<32x32xf32>
    %94 = arith.addf %76, %93 : vector<32x32xf32>
    %cst_42 = arith.constant dense<0.000000e+00> : vector<32xf32>
    %95 = vector.multi_reduction <add>, %94, %cst_42 [1] : vector<32x32xf32> to vector<32xf32>
    %96 = vector.shape_cast %95 : vector<32xf32> to vector<32x1xf32>
    %cst_43 = arith.constant 3.200000e+01 : f32
    %97 = vector.broadcast %cst_43 : f32 to vector<32x1xf32>
    %98 = arith.divf %96, %97 : vector<32x1xf32>
    %99 = vector.broadcast %98 : vector<32x1xf32> to vector<32x32xf32>
    %100 = arith.subf %94, %99 : vector<32x32xf32>
    %101 = arith.mulf %100, %100 : vector<32x32xf32>
    %cst_44 = arith.constant dense<0.000000e+00> : vector<32xf32>
    %102 = vector.multi_reduction <add>, %101, %cst_44 [1] : vector<32x32xf32> to vector<32xf32>
    %103 = vector.shape_cast %102 : vector<32xf32> to vector<32x1xf32>
    %cst_45 = arith.constant 3.200000e+01 : f32
    %104 = vector.broadcast %cst_45 : f32 to vector<32x1xf32>
    %105 = arith.divf %103, %104 : vector<32x1xf32>
    %106 = vector.broadcast %98 : vector<32x1xf32> to vector<32x32xf32>
    %107 = arith.subf %94, %106 : vector<32x32xf32>
    %cst_46 = arith.constant 9.99999974E-6 : f32
    %108 = vector.broadcast %cst_46 : f32 to vector<32x1xf32>
    %109 = arith.addf %105, %108 : vector<32x1xf32>
    %110 = math.rsqrt %109 : vector<32x1xf32>
    %111 = vector.broadcast %110 : vector<32x1xf32> to vector<32x32xf32>
    %112 = arith.mulf %107, %111 : vector<32x32xf32>
    %113 = vector.broadcast %10 : vector<1x32xf32> to vector<32x32xf32>
    %114 = arith.mulf %112, %113 : vector<32x32xf32>
    %115 = vector.broadcast %11 : vector<1x32xf32> to vector<32x32xf32>
    %116 = arith.addf %114, %115 : vector<32x32xf32>
    %117 = vector.extract_strided_slice %116 {offsets = [0, 0], sizes = [16, 32], strides = [1, 1]} : vector<32x32xf32> to vector<16x32xf32>
    %c0_47 = arith.constant 0 : index
    %c0_48 = arith.constant 0 : index
    %118 = vector.load %arg10[%c0_47, %c0_48] : memref<16x32xf32, #tpu.memory_space<vmem>>, vector<16x32xf32>
    tpu.vector_store %arg10[%c0_47, %c0_48], %117 {strides = array<i32>} : memref<16x32xf32, #tpu.memory_space<vmem>>, vector<16x32xf32>,
    %119 = vector.extract_strided_slice %116 {offsets = [16, 0], sizes = [16, 32], strides = [1, 1]} : vector<32x32xf32> to vector<16x32xf32>
    %c0_49 = arith.constant 0 : index
    %c0_50 = arith.constant 0 : index
    %120 = vector.load %arg11[%c0_49, %c0_50] : memref<16x32xf32, #tpu.memory_space<vmem>>, vector<16x32xf32>
    tpu.vector_store %arg11[%c0_49, %c0_50], %119 {strides = array<i32>} : memref<16x32xf32, #tpu.memory_space<vmem>>, vector<16x32xf32>,
    return
  }
}

</mosaic_0001>

<bundles_post_ra>
// kernel: cross_transformer_forward.1
= control target key start
LH: loop header
LB: loop body
LE: loop exit
PB: predicated region body
PF: predicated region fallthrough
CT: control target
= control target key end

     0   :  { %17 = vsyncpa [#allocation3], 0  ;;  %vm58_vm0 = vcmask 261120   ;;  %s1875_s29 = smov 32   ;;  %s2547_s0 = inlined_call_operand.vmem [shape: f32[16,32], index: 0, kind: input, shape index: {}]   ;;  %s2548_s1 = inlined_call_operand.vmem [shape: f32[16,32], index: 1, kind: input, shape index: {}]   ;;  %s2549_s2 = inlined_call_operand.vmem [shape: f32[32,128], index: 2, kind: input, shape index: {}]   ;;  %s2550_s3 = inlined_call_operand.vmem [shape: f32[32,32], index: 3, kind: input, shape index: {}]   ;;  %s2551_s4 = inlined_call_operand.vmem [shape: f32[32,128], index: 4, kind: input, shape index: {}]   ;;  %s2552_s5 = inlined_call_operand.vmem [shape: f32[128,32], index: 5, kind: input, shape index: {}]   ;;  %s2553_s6 = inlined_call_operand.vmem [shape: f32[9,32], index: 6, kind: input, shape index: {}]   ;;  %s2554_s7 = inlined_call_operand.vmem [shape: f32[1,128], index: 7, kind: input, shape index: {}]   ;;  %s2555_s8 = inlined_call_operand.vmem [shape: f32[128,32], index: 8, kind: input, shape index: {}]   ;;  %s2556_s9 = inlined_call_operand.vmem [shape: f32[128,16], index: 9, kind: input, shape index: {}]   ;;  %s2557_s10 = inlined_call_operand.hbm [shape: f32[16,32], index: 10, kind: output, shape index: {0}]   ;;  %s2558_s11 = inlined_call_operand.hbm [shape: f32[16,32], index: 11, kind: output, shape index: {1}]  }
   0x1   :  { %v54_v0 = vld [vmem:[%s2549_s2] sm:$0xff]  ;;  %v55_v1 = vld [vmem:[%s2549_s2 + $0x8] sm:$0xff]  ;;  %v56_v2 = vld [vmem:[%s2549_s2 + $0x10] sm:$0xff] }
   0x2   :  { %v1656_v3 = vpack.c.bf16 %v55_v1, %v54_v0  ;;  %v57_v4 = vld [vmem:[%s2549_s2 + $0x18] sm:$0xff]  ;;  %v1957_v5 = vld [vmem:[%s2547_s0] sm:$0xff] }
   0x3   :  { %v1660_v6 = vpack.c.bf16 %v57_v4, %v56_v2  ;;  %1525 = vmatprep.mubr.msk.f32.mxu0 %vm58_vm0, %v1957_v5  ;;  %v1384_v7 = vld [vmem:[%s2553_s6 + $0x1] ss:$0 sm:$0xff] }
   0x4   :  { %1657 = vmatprep.subr.bf16.mxu0 %v1656_v3  ;;  %185 = vrot.lane.b32.xlu0 %v1384_v7, %s1875_s29 }
   0x5   :  { %18 = vsyncpa [#allocation5], 0  ;;  %1659 = vmatpush3.bf16.msra.mxu0 %v1656_v3  ;;  %v1967_v8 = vld [vmem:[%s2547_s0 + $0x8] sm:$0xff]  ;;  %v1972_v9 = vld [vmem:[%s2548_s1] sm:$0xff]  ;;  %s1876_s18 = smov 96   ;;  %vm451_vm2 = vcmask 130048  }
   0x6   :  { %1661 = vmatprep.subr.bf16.mxu0 %v1660_v6  ;;  %v43_v10 = vsub.f32 %v1972_v9, %v1957_v5  ;;  %v1983_v11 = vld [vmem:[%s2548_s1 + $0x8] sm:$0xff]  ;;  %v1383_v13 = vld [vmem:[%s2553_s6] ss:$0 sm:$0xff]  ;;  %vm1665_vm1 = vmpackc.low %vm58_vm0, %vm58_vm0  ;;  %s1877_s16 = smov 64  }
   0x7   :  { %v44_v12 = vsub.f32 %v1983_v11, %v1967_v8  ;;  %v1999_v17 = vld [vmem:[%s2555_s8] sm:$0xff]  ;;  %v2014_v34 = vld [vmem:[%s2555_s8 + $0x8] sm:$0xff]  ;;  %v2019_v35 = vld [vmem:[%s2555_s8 + $0x10] sm:$0xff] }
   0x8   :  { %v2027_v38 = vld [vmem:[%s2555_s8 + $0x18] sm:$0xff]  ;;  %v2033_v39 = vld [vmem:[%s2555_s8 + $0x20] sm:$0xff]  ;;  %v2041_v42 = vld [vmem:[%s2555_s8 + $0x28] sm:$0xff] }
   0x9   :  { %1663 = vmatpush3.bf16.msra.mxu0 %v1660_v6  ;;  %v2047_v43 = vld [vmem:[%s2555_s8 + $0x30] sm:$0xff]  ;;  %v2056_v46 = vld [vmem:[%s2555_s8 + $0x38] sm:$0xff]  ;;  %v2062_v47 = vld [vmem:[%s2555_s8 + $0x40] sm:$0xff] }
   0xa   :  { %v2070_v50 = vld [vmem:[%s2555_s8 + $0x48] sm:$0xff]  ;;  %v2076_v51 = vld [vmem:[%s2555_s8 + $0x50] sm:$0xff]  ;;  %v2085_v54 = vld [vmem:[%s2555_s8 + $0x58] sm:$0xff] }
   0xb   :  { %v2091_v55 = vld [vmem:[%s2555_s8 + $0x60] sm:$0xff]  ;;  %v2099_v58 = vld [vmem:[%s2555_s8 + $0x68] sm:$0xff]  ;;  %v2105_v59 = vld [vmem:[%s2555_s8 + $0x70] sm:$0xff] }
   0xc   :  { %1526 = vmatmul.mubr.msk.f32.vlgmr.msra.gmra.mrb[0].mxu0 %vm58_vm0, %v1967_v8  ;;  %v2114_v62 = vld [vmem:[%s2555_s8 + $0x78] sm:$0xff]  ;;  %v233_v0 = vld [vmem:[%s2556_s9 + $0x8] sm:$0xff]  ;;  %v232_v2 = vld [vmem:[%s2556_s9] sm:$0xff] }
   0xd   :  { %1528 = vmatprep.mubr.msk.f32.mxu0 %vm58_vm0, %v1972_v9 }
  0x10   :  { %1529 = vmatmul.mubr.msk.f32.gmra.mrb[2].mxu0 %vm58_vm0, %v1983_v11 }
  0x11   :  { %1531 = vmatprep.mubr.msk.f32.mxu0 %vm58_vm0, %v43_v10  ;;  %v234_v10 = vld [vmem:[%s2556_s9 + $0x10] sm:$0xff] }
  0x14   :  { %1532 = vmatmul.mubr.msk.f32.gmra.mrb[4].mxu0 %vm58_vm0, %v44_v12  ;;  %v235_v12 = vld [vmem:[%s2556_s9 + $0x18] sm:$0xff] }
  0x76   :  { %v186_v24 = vpop.permute.xlu0 %185 }
  0xdf   :  { %v1527_v14 = vpop.f32.mrb[0].mxu0 }
  0xe0   :  { %v1994_v15 = vadd.f32 %v1527_v14, %v1383_v13  ;;  %v143_v16 = vpop.f32.mrb[1].mxu0 }
  0xe1   :  { %v176_v18 = vadd.f32 %v1383_v13, %v143_v16 }
  0xe2   :  { %v217_v36 = vmul.f32 %v2014_v34, %v1994_v15  ;;  %v221_v44 = vmul.f32 %v2041_v42, %v1994_v15  ;;  %v225_v52 = vmul.f32 %v2070_v50, %v1994_v15  ;;  %v229_v60 = vmul.f32 %v2099_v58, %v1994_v15 }
  0xe3   :  { %v1530_v19 = vpop.f32.mrb[2].mxu0  ;;  %v216_v20 = vmul.f32 %v1999_v17, %v176_v18  ;;  %v220_v41 = vmul.f32 %v2033_v39, %v176_v18  ;;  %v224_v49 = vmul.f32 %v2062_v47, %v176_v18  ;;  %v228_v57 = vmul.f32 %v2091_v55, %v176_v18 }
  0xe4   :  { %v179_v21 = vadd.f32 %v1530_v19, %v1383_v13  ;;  %v153_v22 = vpop.f32.mrb[3].mxu0  ;;  %v237_v19 = vld [vmem:[%s2556_s9 + $0x28] sm:$0xff] }
  0xe5   :  { %v178_v23 = vadd.f32 %v1383_v13, %v153_v22  ;;  %1538 = vmatprep.mubr.msk.f32.mxu1 %vm58_vm0, %v216_v20 }
  0xe6   :  { %v219_v40 = vmul.f32 %v2027_v38, %v179_v21  ;;  %v223_v48 = vmul.f32 %v2056_v46, %v179_v21  ;;  %v227_v56 = vmul.f32 %v2085_v54, %v179_v21  ;;  %v231_v63 = vmul.f32 %v2114_v62, %v179_v21 }
  0xe7   :  { %v2003_v25 = vpop.f32.mrb[4].mxu0  ;;  %v218_v37 = vmul.f32 %v2019_v35, %v178_v23  ;;  %v222_v45 = vmul.f32 %v2047_v43, %v178_v23  ;;  %v226_v53 = vmul.f32 %v2076_v51, %v178_v23  ;;  %v230_v61 = vmul.f32 %v2105_v59, %v178_v23 }
  0xe8   :  { %v189_v26 = vadd.f32 %v2003_v25, %v186_v24  ;;  %v2006_v27 = vpop.f32.mrb[5].mxu0 }
  0xe9   :  { %v188_v28 = vadd.f32 %v186_v24, %v2006_v27 }
  0xeb   :  { %v1729_v29 = vpack.i.bf16 %v189_v26, %v188_v28  ;;  %v236_v26 = vld [vmem:[%s2556_s9 + $0x20] sm:$0xff] }
  0xed   :  { %1730 = vrot.lane.b32.xlu0 %v1729_v29, %s1876_s18 }
 0x15f   :  { %v1731_v30 = vpop.permute.xlu0 %1730 }
 0x160   :  { %v1733_v31 = vunpack.i.h.bf16 %v1731_v30  ;;  %v1732_v32 = vunpack.i.l.bf16 %v1731_v30 }
 0x162   :  { %v1664_v33 = vpack.c.bf16 %v1733_v31, %v1732_v32  ;;  %v239_v32 = vld [vmem:[%s2556_s9 + $0x38] sm:$0xff] }
 0x164   :  { %1666 = vmatprep.subr.msk.bf16.mxu1 %vm1665_vm1, %v1664_v33 }
 0x165   :  { %1669 = vmatpush3.bf16.xpose.msk.msra.mxu1 %vm1665_vm1, %v1664_v33 }
 0x16c   :  { %1539 = vmatmul.mubr.msk.f32.vlgmr.msra.gmra.mrb[0].mxu1 %vm58_vm0, %v217_v36 }
 0x16d   :  { %1541 = vmatprep.mubr.msk.f32.mxu1 %vm58_vm0, %v218_v37  ;;  %v243_v37 = vld [vmem:[%s2556_s9 + $0x58] sm:$0xff] }
 0x170   :  { %1542 = vmatmul.mubr.msk.f32.gmra.mrb[2].mxu1 %vm58_vm0, %v219_v40 }
 0x171   :  { %1544 = vmatprep.mubr.msk.f32.mxu1 %vm58_vm0, %v220_v41 }
 0x174   :  { %1545 = vmatmul.mubr.msk.f32.gmra.mrb[4].mxu1 %vm58_vm0, %v221_v44  ;;  %v238_v44 = vld [vmem:[%s2556_s9 + $0x30] sm:$0xff] }
 0x175   :  { %1547 = vmatprep.mubr.msk.f32.mxu1 %vm58_vm0, %v222_v45 }
 0x178   :  { %1548 = vmatmul.mubr.msk.f32.gmra.mrb[6].mxu1 %vm58_vm0, %v223_v48 }
 0x179   :  { %1550 = vmatprep.mubr.msk.f32.mxu1 %vm58_vm0, %v224_v49 }
 0x17c   :  { %1551 = vmatmul.mubr.msk.f32.gmra.mrb[8].mxu1 %vm58_vm0, %v225_v52  ;;  %v245_v52 = vld [vmem:[%s2556_s9 + $0x68] sm:$0xff] }
 0x17d   :  { %1553 = vmatprep.mubr.msk.f32.mxu1 %vm58_vm0, %v226_v53 }
 0x180   :  { %1554 = vmatmul.mubr.msk.f32.gmra.mrb[10].mxu1 %vm58_vm0, %v227_v56 }
 0x181   :  { %1556 = vmatprep.mubr.msk.f32.mxu1 %vm58_vm0, %v228_v57 }
 0x184   :  { %1557 = vmatmul.mubr.msk.f32.gmra.mrb[12].mxu1 %vm58_vm0, %v229_v60  ;;  %v241_v60 = vld [vmem:[%s2556_s9 + $0x48] sm:$0xff] }
 0x185   :  { %1559 = vmatprep.mubr.msk.f32.mxu1 %vm58_vm0, %v230_v61 }
 0x188   :  { %1560 = vmatmul.mubr.msk.f32.gmra.mrb[14].mxu1 %vm58_vm0, %v231_v63 }
 0x23f   :  { %v1540_v1 = vpop.f32.mrb[0].mxu1 }
 0x240   :  { %v2126_v3 = vadd.f32 %v1540_v1, %v233_v0  ;;  %v372_v4 = vpop.f32.mrb[1].mxu1  ;;  %v247_v1 = vld [vmem:[%s2556_s9 + $0x78] sm:$0xff] }
 0x241   :  { %v2128_v6 = vadd.f32 %v372_v4, %v232_v2 }
 0x242   :  { %v455_v7 = vsel %vm451_vm2, %v2126_v3, -inf }
 0x243   :  { %456 = vmax.xlane.f32.xlu1 %v455_v7  ;;  %v1543_v13 = vpop.f32.mrb[2].mxu1  ;;  %v452_v18 = vsel %vm451_vm2, %v2128_v6, -inf }
 0x244   :  { %v382_v14 = vpop.f32.mrb[3].mxu1  ;;  %v2140_v16 = vadd.f32 %v1543_v13, %v235_v12 }
 0x245   :  { %v2138_v15 = vadd.f32 %v382_v14, %v234_v10  ;;  %v240_v10 = vld [vmem:[%s2556_s9 + $0x40] sm:$0xff] }
 0x246   :  { %v461_v24 = vsel %vm451_vm2, %v2140_v16, -inf }
 0x247   :  { %v1546_v20 = vpop.f32.mrb[4].mxu1  ;;  %453 = vmax.xlane.f32.xlu1 %v452_v18  ;;  %v458_v21 = vsel %vm451_vm2, %v2138_v15, -inf }
 0x248   :  { %v392_v22 = vpop.f32.mrb[5].mxu1  ;;  %459 = vmax.xlane.f32.xlu0 %v458_v21  ;;  %v2149_v23 = vadd.f32 %v1546_v20, %v237_v19  ;;  %v242_v21 = vld [vmem:[%s2556_s9 + $0x50] sm:$0xff] }
 0x249   :  { %v2156_v30 = vadd.f32 %v392_v22, %v236_v26  ;;  %v244_v26 = vld [vmem:[%s2556_s9 + $0x60] sm:$0xff] }
 0x24a   :  { %v467_v31 = vsel %vm451_vm2, %v2149_v23, -inf }
 0x24b   :  { %v1549_v28 = vpop.f32.mrb[6].mxu1  ;;  %462 = vmax.xlane.f32.xlu1 %v461_v24  ;;  %v464_v41 = vsel %vm451_vm2, %v2156_v30, -inf }
 0x24c   :  { %v402_v29 = vpop.f32.mrb[7].mxu1  ;;  %v2166_v40 = vadd.f32 %v1549_v28, %v239_v32 }
 0x24d   :  { %v2178_v53 = vadd.f32 %v402_v29, %v238_v44 }
 0x24e   :  { %v473_v57 = vsel %vm451_vm2, %v2166_v40, -inf }
 0x24f   :  { %v1552_v33 = vpop.f32.mrb[8].mxu1  ;;  %468 = vmax.xlane.f32.xlu1 %v467_v31  ;;  %v470_v7 = vsel %vm451_vm2, %v2178_v53, -inf  ;;  %v246_v31 = vld [vmem:[%s2556_s9 + $0x70] sm:$0xff] }
 0x250   :  { %v412_v36 = vpop.f32.mrb[9].mxu1  ;;  %v2192_v2 = vadd.f32 %v1552_v33, %v241_v60 }
 0x251   :  { %v2203_v18 = vadd.f32 %v412_v36, %v240_v10 }
 0x252   :  { %v479_v20 = vsel %vm451_vm2, %v2192_v2, -inf }
 0x253   :  { %v1555_v45 = vpop.f32.mrb[10].mxu1  ;;  %465 = vmax.xlane.f32.xlu1 %v464_v41  ;;  %v476_v24 = vsel %vm451_vm2, %v2203_v18, -inf }
 0x254   :  { %v2173_v48 = vadd.f32 %v1555_v45, %v243_v37  ;;  %v422_v49 = vpop.f32.mrb[11].mxu1  ;;  %v1385_v37 = vld [vmem:[%s2553_s6 + $0x2] ss:$0 sm:$0xff] }
 0x255   :  { %v2212_v22 = vadd.f32 %v422_v49, %v242_v21 }
 0x256   :  { %v485_v56 = vsel %vm451_vm2, %v2173_v48, -inf }
 0x257   :  { %v1558_v61 = vpop.f32.mrb[12].mxu1  ;;  %486 = vmax.xlane.f32.xlu0 %v485_v56  ;;  %474 = vmax.xlane.f32.xlu1 %v473_v57  ;;  %v482_v29 = vsel %vm451_vm2, %v2212_v22, -inf }
 0x258   :  { %v2187_v63 = vadd.f32 %v1558_v61, %v245_v52  ;;  %v432_v0 = vpop.f32.mrb[13].mxu1 }
 0x259   :  { %v2219_v28 = vadd.f32 %v432_v0, %v244_v26 }
 0x25a   :  { %v491_v4 = vsel %vm451_vm2, %v2187_v63, -inf }
 0x25b   :  { %v1561_v12 = vpop.f32.mrb[14].mxu1  ;;  %492 = vmax.xlane.f32.xlu0 %v491_v4  ;;  %471 = vmax.xlane.f32.xlu1 %v470_v7  ;;  %v488_v33 = vsel %vm451_vm2, %v2219_v28, -inf }
 0x25c   :  { %v2201_v13 = vadd.f32 %v1561_v12, %v247_v1  ;;  %v442_v14 = vpop.f32.mrb[15].mxu1 }
 0x25d   :  { %v2226_v32 = vadd.f32 %v442_v14, %v246_v31 }
 0x25e   :  { %v497_v19 = vsel %vm451_vm2, %v2201_v13, -inf }
 0x25f   :  { %498 = vmax.xlane.f32.xlu0 %v497_v19  ;;  %480 = vmax.xlane.f32.xlu1 %v479_v20  ;;  %v494_v36 = vsel %vm451_vm2, %v2226_v32, -inf }
 0x263   :  { %477 = vmax.xlane.f32.xlu1 %v476_v24 }
 0x267   :  { %483 = vmax.xlane.f32.xlu1 %v482_v29 }
 0x26b   :  { %489 = vmax.xlane.f32.xlu1 %v488_v33 }
 0x26f   :  { %495 = vmax.xlane.f32.xlu1 %v494_v36 }
 0x280   :  { %195 = vrot.lane.b32.xlu1 %v1385_v37, %s1877_s16 }
 0x2d0   :  { %v457_v41 = vpop.xlane.xlu1 %456 }
 0x2d1   :  { %v501_v44 = vsub.f32 %v2126_v3, %v457_v41 }
 0x2d3   :  { %v518_v45 = vmul.f32 1.442695, %v501_v44 }
 0x2d4   :  { %v454_v49 = vpop.xlane.xlu1 %453 }
 0x2d5   :  { %1739 = vpow2.f32 %v518_v45  ;;  %v500_v52 = vsub.f32 %v2128_v6, %v454_v49  ;;  %v460_v56 = vpop.xlane.xlu0 %459 }
 0x2d6   :  { %v502_v60 = vsub.f32 %v2138_v15, %v460_v56 }
 0x2d7   :  { %v516_v57 = vmul.f32 1.442695, %v500_v52 }
 0x2d8   :  { %v463_v61 = vpop.xlane.xlu1 %462  ;;  %v520_v1 = vmul.f32 1.442695, %v502_v60 }
 0x2d9   :  { %1741 = vpow2.f32 %v516_v57  ;;  %v503_v0 = vsub.f32 %v2140_v16, %v463_v61 }
 0x2db   :  { %v522_v4 = vmul.f32 1.442695, %v503_v0 }
 0x2dc   :  { %v469_v7 = vpop.xlane.xlu1 %468 }
 0x2dd   :  { %1743 = vpow2.f32 %v522_v4  ;;  %v505_v10 = vsub.f32 %v2149_v23, %v469_v7 }
 0x2de   :  { %1745 = vpow2.f32 %v520_v1 }
 0x2df   :  { %v2241_v3 = vpop.eup %1739  ;;  %v526_v12 = vmul.f32 1.442695, %v505_v10 }
 0x2e0   :  { %v466_v14 = vpop.xlane.xlu1 %465  ;;  %v551_v6 = vsel %vm451_vm2, %v2241_v3, 0.0 }
 0x2e1   :  { %v504_v15 = vsub.f32 %v2156_v30, %v466_v14  ;;  %552 = vadd.xlane.f32.xlu0 %v551_v6  ;;  %1747 = vpow2.f32 %v526_v12 }
 0x2e3   :  { %v2246_v19 = vpop.eup %1741  ;;  %v524_v16 = vmul.f32 1.442695, %v504_v15 }
 0x2e4   :  { %v487_v20 = vpop.xlane.xlu0 %486  ;;  %v475_v21 = vpop.xlane.xlu1 %474  ;;  %v548_v23 = vsel %vm451_vm2, %v2246_v19, 0.0 }
 0x2e5   :  { %1749 = vpow2.f32 %v524_v16  ;;  %v507_v24 = vsub.f32 %v2166_v40, %v475_v21  ;;  %549 = vadd.xlane.f32.xlu0 %v548_v23 }
 0x2e7   :  { %v2251_v26 = vpop.eup %1743  ;;  %v530_v29 = vmul.f32 1.442695, %v507_v24 }
 0x2e8   :  { %v493_v31 = vpop.xlane.xlu0 %492  ;;  %v472_v33 = vpop.xlane.xlu1 %471  ;;  %v557_v30 = vsel %vm451_vm2, %v2251_v26, 0.0 }
 0x2e9   :  { %v2255_v36 = vpop.eup %1745  ;;  %v513_v37 = vsub.f32 %v2187_v63, %v493_v31  ;;  %v506_v41 = vsub.f32 %v2178_v53, %v472_v33  ;;  %558 = vadd.xlane.f32.xlu0 %v557_v30  ;;  %1751 = vpow2.f32 %v530_v29  ;;  %v511_v53 = vsub.f32 %v2173_v48, %v487_v20 }
 0x2ea   :  { %v554_v49 = vsel %vm451_vm2, %v2255_v36, 0.0 }
 0x2eb   :  { %v542_v44 = vmul.f32 1.442695, %v513_v37  ;;  %v528_v45 = vmul.f32 1.442695, %v506_v41  ;;  %v2261_v52 = vpop.eup %1747  ;;  %v538_v7 = vmul.f32 1.442695, %v511_v53 }
 0x2ec   :  { %v481_v40 = vpop.xlane.xlu1 %480  ;;  %v563_v61 = vsel %vm451_vm2, %v2261_v52, 0.0 }
 0x2ed   :  { %1753 = vpow2.f32 %v542_v44  ;;  %v509_v56 = vsub.f32 %v2192_v2, %v481_v40  ;;  %555 = vadd.xlane.f32.xlu0 %v554_v49 }
 0x2ee   :  { %1755 = vpow2.f32 %v528_v45 }
 0x2ef   :  { %v2264_v57 = vpop.eup %1749  ;;  %v534_v63 = vmul.f32 1.442695, %v509_v56 }
 0x2f0   :  { %v478_v60 = vpop.xlane.xlu1 %477  ;;  %v560_v0 = vsel %vm451_vm2, %v2264_v57, 0.0 }
 0x2f1   :  { %v508_v1 = vsub.f32 %v2203_v18, %v478_v60  ;;  %564 = vadd.xlane.f32.xlu0 %v563_v61  ;;  %561 = vadd.xlane.f32.xlu1 %v560_v0  ;;  %1757 = vpow2.f32 %v534_v63  ;;  %v499_v18 = vpop.xlane.xlu0 %498 }
 0x2f2   :  { %v515_v23 = vsub.f32 %v2201_v13, %v499_v18 }
 0x2f3   :  { %v532_v2 = vmul.f32 1.442695, %v508_v1  ;;  %v2272_v4 = vpop.eup %1751 }
 0x2f4   :  { %v484_v10 = vpop.xlane.xlu1 %483  ;;  %v569_v12 = vsel %vm451_vm2, %v2272_v4, 0.0  ;;  %v546_v37 = vmul.f32 1.442695, %v515_v23 }
 0x2f5   :  { %1759 = vpow2.f32 %v532_v2  ;;  %v510_v48 = vsub.f32 %v2212_v22, %v484_v10  ;;  %570 = vadd.xlane.f32.xlu0 %v569_v12 }
 0x2f6   :  { %1761 = vpow2.f32 %v538_v7 }
 0x2f7   :  { %v2277_v14 = vpop.eup %1753  ;;  %v536_v15 = vmul.f32 1.442695, %v510_v48 }
 0x2f8   :  { %v2279_v6 = vpop.eup %1755  ;;  %v490_v16 = vpop.xlane.xlu1 %489  ;;  %v587_v20 = vsel %vm451_vm2, %v2277_v14, 0.0 }
 0x2f9   :  { %v512_v21 = vsub.f32 %v2219_v28, %v490_v16  ;;  %588 = vadd.xlane.f32.xlu1 %v587_v20  ;;  %v566_v22 = vsel %vm451_vm2, %v2279_v6, 0.0  ;;  %1763 = vpow2.f32 %v536_v15 }
 0x2fa   :  { %567 = vadd.xlane.f32.xlu0 %v566_v22 }
 0x2fb   :  { %v540_v24 = vmul.f32 1.442695, %v512_v21  ;;  %v2287_v29 = vpop.eup %1757 }
 0x2fc   :  { %v496_v31 = vpop.xlane.xlu1 %495  ;;  %v575_v30 = vsel %vm451_vm2, %v2287_v29, 0.0 }
 0x2fd   :  { %1765 = vpow2.f32 %v540_v24  ;;  %v514_v33 = vsub.f32 %v2226_v32, %v496_v31 }
 0x2fe   :  { %576 = vadd.xlane.f32.xlu0 %v575_v30 }
 0x2ff   :  { %v2292_v28 = vpop.eup %1759  ;;  %v544_v41 = vmul.f32 1.442695, %v514_v33 }
 0x300   :  { %v196_v44 = vpop.permute.xlu1 %195  ;;  %v572_v13 = vsel %vm451_vm2, %v2292_v28, 0.0  ;;  %v2298_v49 = vpop.eup %1761 }
 0x301   :  { %1767 = vpow2.f32 %v544_v41  ;;  %v198_v45 = vadd.f32 %v196_v44, %v2006_v27  ;;  %v199_v40 = vadd.f32 %v2003_v25, %v196_v44  ;;  %v581_v56 = vsel %vm451_vm2, %v2298_v49, 0.0 }
 0x302   :  { %573 = vadd.xlane.f32.xlu0 %v572_v13  ;;  %1769 = vpow2.f32 %v546_v37 }
 0x303   :  { %v1734_v32 = vpack.i.bf16 %v199_v40, %v198_v45  ;;  %v2302_v63 = vpop.eup %1763 }
 0x304   :  { %v578_v27 = vsel %vm451_vm2, %v2302_v63, 0.0 }
 0x306   :  { %582 = vadd.xlane.f32.xlu0 %v581_v56 }
 0x307   :  { %v2304_v53 = vpop.eup %1765 }
 0x308   :  { %v584_v60 = vsel %vm451_vm2, %v2304_v53, 0.0 }
 0x309   :  { %585 = vadd.xlane.f32.xlu1 %v584_v60 }
 0x30a   :  { %579 = vadd.xlane.f32.xlu0 %v578_v27 }
 0x30b   :  { %v2310_v25 = vpop.eup %1767 }
 0x30c   :  { %v590_v61 = vsel %vm451_vm2, %v2310_v25, 0.0  ;;  %v2314_v0 = vpop.eup %1769 }
 0x30d   :  { %591 = vadd.xlane.f32.xlu1 %v590_v61  ;;  %v593_v1 = vsel %vm451_vm2, %v2314_v0, 0.0 }
 0x311   :  { %594 = vadd.xlane.f32.xlu1 %v593_v1 }
 0x320   :  { %1735 = vrot.lane.b32.xlu0 %v1734_v32, %s1877_s16 }
 0x36e   :  { %v553_v2 = vpop.xlane.xlu0 %552 }
 0x372   :  { %v550_v7 = vpop.xlane.xlu0 %549 }
 0x373   :  { %1771 = vrcp.f32 %v550_v7 }
 0x374   :  { %1773 = vrcp.f32 %v553_v2 }
 0x376   :  { %v559_v10 = vpop.xlane.xlu0 %558 }
 0x37a   :  { %v556_v48 = vpop.xlane.xlu0 %555 }
 0x37b   :  { %1775 = vrcp.f32 %v556_v48 }
 0x37c   :  { %1777 = vrcp.f32 %v559_v10 }
 0x37d   :  { %v1772_v12 = vpop.eup %1771 }
 0x37e   :  { %v565_v18 = vpop.xlane.xlu0 %564  ;;  %v612_v15 = vmul.f32 %v1772_v12, %v2246_v19  ;;  %v562_v24 = vpop.xlane.xlu1 %561 }
 0x37f   :  { %1779 = vrcp.f32 %v562_v24  ;;  %v1774_v44 = vpop.eup %1773 }
 0x380   :  { %1566 = vmatprep.mubr.msk.f32.mxu0 %vm451_vm2, %v612_v15  ;;  %1781 = vrcp.f32 %v565_v18  ;;  %v613_v45 = vmul.f32 %v1774_v44, %v2241_v3 }
 0x382   :  { %v571_v16 = vpop.xlane.xlu0 %570 }
 0x385   :  { %v1776_v13 = vpop.eup %1775 }
 0x386   :  { %v589_v41 = vpop.xlane.xlu1 %588  ;;  %v1778_v32 = vpop.eup %1777  ;;  %v614_v56 = vmul.f32 %v1776_v13, %v2255_v36 }
 0x387   :  { %v568_v20 = vpop.xlane.xlu0 %567  ;;  %v615_v27 = vmul.f32 %v1778_v32, %v2251_v26 }
 0x388   :  { %1783 = vrcp.f32 %v568_v20 }
 0x389   :  { %1785 = vrcp.f32 %v571_v16  ;;  %v1780_v60 = vpop.eup %1779 }
 0x38a   :  { %v1782_v61 = vpop.eup %1781  ;;  %v616_v1 = vmul.f32 %v1780_v60, %v2264_v57 }
 0x38b   :  { %v577_v21 = vpop.xlane.xlu0 %576  ;;  %v617_v3 = vmul.f32 %v1782_v61, %v2261_v52 }
 0x38f   :  { %v574_v22 = vpop.xlane.xlu0 %573 }
 0x390   :  { %1787 = vrcp.f32 %v574_v22 }
 0x391   :  { %1789 = vrcp.f32 %v577_v21 }
 0x392   :  { %v1784_v2 = vpop.eup %1783 }
 0x393   :  { %v583_v23 = vpop.xlane.xlu0 %582  ;;  %v1786_v36 = vpop.eup %1785  ;;  %v618_v10 = vmul.f32 %v1784_v2, %v2279_v6 }
 0x394   :  { %v619_v57 = vmul.f32 %v1786_v36, %v2272_v4 }
 0x396   :  { %v586_v40 = vpop.xlane.xlu1 %585 }
 0x397   :  { %v580_v31 = vpop.xlane.xlu0 %579 }
 0x398   :  { %1791 = vrcp.f32 %v580_v31 }
 0x399   :  { %1793 = vrcp.f32 %v583_v23 }
 0x39a   :  { %v592_v7 = vpop.xlane.xlu1 %591  ;;  %1795 = vrcp.f32 %v586_v40  ;;  %v1788_v48 = vpop.eup %1787 }
 0x39b   :  { %v1736_v33 = vpop.permute.xlu0 %1735  ;;  %1797 = vrcp.f32 %v589_v41  ;;  %v1790_v12 = vpop.eup %1789  ;;  %v620_v18 = vmul.f32 %v1788_v48, %v2292_v28 }
 0x39c   :  { %v1738_v30 = vunpack.i.h.bf16 %v1736_v33  ;;  %v1737_v37 = vunpack.i.l.bf16 %v1736_v33  ;;  %1799 = vrcp.f32 %v592_v7  ;;  %v621_v52 = vmul.f32 %v1790_v12, %v2287_v29 }
 0x39e   :  { %v1670_v19 = vpack.c.bf16 %v1738_v30, %v1737_v37  ;;  %v595_v26 = vpop.xlane.xlu1 %594 }
 0x39f   :  { %1801 = vrcp.f32 %v595_v26 }
 0x3a0   :  { %1671 = vmatprep.subr.bf16.mxu0 %v1670_v19 }
 0x3a1   :  { %1673 = vmatpush3.bf16.msra.mxu0 %v1670_v19 }
 0x3a2   :  { %v1792_v15 = vpop.eup %1791 }
 0x3a3   :  { %v1794_v6 = vpop.eup %1793  ;;  %v622_v16 = vmul.f32 %v1792_v15, %v2302_v63 }
 0x3a4   :  { %1567 = vmatmul.mubr.msk.f32.vlgmr.msra.gmra.mrb[6].mxu0 %vm451_vm2, %v613_v45  ;;  %v1796_v20 = vpop.eup %1795  ;;  %v623_v4 = vmul.f32 %v1794_v6, %v2298_v49  ;;  %v857_v49 = vld [vmem:[%s2550_s3] sm:$0xff] }
 0x3a5   :  { %1569 = vmatprep.mubr.msk.f32.mxu0 %vm451_vm2, %v614_v56  ;;  %v1798_v21 = vpop.eup %1797  ;;  %v624_v28 = vmul.f32 %v1796_v20, %v2304_v53  ;;  %v858_v53 = vld [vmem:[%s2550_s3 + $0x8] sm:$0xff] }
 0x3a6   :  { %v1800_v22 = vpop.eup %1799  ;;  %v625_v29 = vmul.f32 %v1798_v21, %v2277_v14  ;;  %v1674_v14 = vpack.c.bf16 %v858_v53, %v857_v49 }
 0x3a7   :  { %v626_v63 = vmul.f32 %v1800_v22, %v2310_v25  ;;  %v859_v25 = vld [vmem:[%s2550_s3 + $0x10] sm:$0xff] }
 0x3a8   :  { %1570 = vmatmul.mubr.msk.f32.gmra.mrb[8].mxu0 %vm451_vm2, %v615_v27  ;;  %1675 = vmatprep.subr.bf16.mxu1 %v1674_v14 }
 0x3a9   :  { %1572 = vmatprep.mubr.msk.f32.mxu0 %vm451_vm2, %v616_v1  ;;  %v1802_v23 = vpop.eup %1801  ;;  %1677 = vmatpush3.bf16.msra.mxu1 %v1674_v14 }
 0x3aa   :  { %v627_v24 = vmul.f32 %v1802_v23, %v2314_v0  ;;  %v860_v0 = vld [vmem:[%s2550_s3 + $0x18] sm:$0xff]  ;;  %s1878_s3 = smov [#allocation2]  }
 0x3ab   :  { %v1678_v31 = vpack.c.bf16 %v860_v0, %v859_v25  ;;  %s1350_s23 = sshll.u32 %s1878_s3, 4  ;;  %s1351_s23 = int_to_ptr.vmem [resolvable:$true] %s1350_s23 }
 0x3ac   :  { %1573 = vmatmul.mubr.msk.f32.gmra.mrb[10].mxu0 %vm451_vm2, %v617_v3  ;;  %s1827_s24 = scalar_lea.vmem %s1351_s23, 256  ;;  %p1832_p1 = scmp.lt.s32.totalorder %s1351_s23, %s1351_s23 }
 0x3ad   :  { %1575 = vmatprep.mubr.msk.f32.mxu0 %vm451_vm2, %v618_v10  ;;  %1679 = vmatprep.subr.bf16.mxu1 %v1678_v31  ;;  %p1828_p0 = scmp.ne.s32.totalorder %s1351_s23, %s1827_s24  ;;  %p1833_p2 = scmp.lt.s32.totalorder %s1827_s24, %s1827_s24 }
 0x3ae   :  { %1681 = vmatpush3.bf16.msra.mxu1 %v1678_v31 }
 0x3af   :  { %p1834_p3 = por %p1833_p2, %p1832_p1 }
 0x3b0   :  { %1576 = vmatmul.mubr.msk.f32.gmra.mrb[12].mxu0 %vm451_vm2, %v619_v57 }
 0x3b1   :  { %1578 = vmatprep.mubr.msk.f32.mxu0 %vm451_vm2, %v620_v18  ;;  %p1835_p4 = pnand %p1834_p3, %p1828_p0 }
 0x3b4   :  { %1579 = vmatmul.mubr.msk.f32.gmra.mrb[14].mxu0 %vm451_vm2, %v621_v52 }
 0x3b5   :  { %1581 = vmatprep.mubr.msk.f32.mxu0 %vm451_vm2, %v622_v16 }
 0x3b8   :  { %1582 = vmatmul.mubr.msk.f32.gmra.mrb[16].mxu0 %vm451_vm2, %v623_v4 }
 0x3b9   :  { %1584 = vmatprep.mubr.msk.f32.mxu0 %vm451_vm2, %v624_v28 }
 0x3bc   :  { %1585 = vmatmul.mubr.msk.f32.gmra.mrb[18].mxu0 %vm451_vm2, %v625_v29 }
 0x3bd   :  { %1587 = vmatprep.mubr.msk.f32.mxu0 %vm451_vm2, %v626_v63 }
 0x3c0   :  { %1588 = vmatmul.mubr.msk.f32.gmra.mrb[20].mxu0 %vm451_vm2, %v627_v24 }
 0x477   :  { %v1568_v33 = vpop.f32.mrb[6].mxu0 }
 0x478   :  { %v750_v30 = vpop.f32.mrb[7].mxu0  ;;  %v830_v44 = vmul.f32 %v1568_v33, %v2014_v34 }
 0x479   :  { %v829_v40 = vmul.f32 %v750_v30, %v1999_v17 }
 0x47b   :  { %v1571_v37 = vpop.f32.mrb[8].mxu0 }
 0x47c   :  { %v760_v41 = vpop.f32.mrb[9].mxu0  ;;  %v832_v61 = vmul.f32 %v1571_v37, %v2027_v38 }
 0x47d   :  { %v831_v7 = vmul.f32 %v760_v41, %v2019_v35 }
 0x47f   :  { %v1574_v19 = vpop.f32.mrb[10].mxu0 }
 0x480   :  { %v834_v13 = vmul.f32 %v1574_v19, %v2041_v42  ;;  %v770_v45 = vpop.f32.mrb[11].mxu0 }
 0x481   :  { %v833_v32 = vmul.f32 %v770_v45, %v2033_v39 }
 0x482   :  { %v846_v56 = vadd.f32 %v834_v13, %v830_v44 }
 0x483   :  { %v845_v60 = vadd.f32 %v833_v32, %v829_v40  ;;  %v1577_v27 = vpop.f32.mrb[12].mxu0 }
 0x484   :  { %v836_v1 = vmul.f32 %v1577_v27, %v2056_v46  ;;  %v780_v2 = vpop.f32.mrb[13].mxu0 }
 0x485   :  { %v835_v3 = vmul.f32 %v780_v2, %v2047_v43 }
 0x486   :  { %v848_v34 = vadd.f32 %v836_v1, %v832_v61 }
 0x487   :  { %v847_v36 = vadd.f32 %v835_v3, %v831_v7  ;;  %v1580_v42 = vpop.f32.mrb[14].mxu0  ;;  %v1035_v3 = vld [vmem:[%s2551_s4] sm:$0xff] }
 0x488   :  { %v838_v10 = vmul.f32 %v1580_v42, %v2070_v50  ;;  %v790_v17 = vpop.f32.mrb[15].mxu0  ;;  %v1037_v42 = vld [vmem:[%s2551_s4 + $0x10] sm:$0xff] }
 0x489   :  { %v837_v39 = vmul.f32 %v790_v17, %v2062_v47 }
 0x48a   :  { %v850_v48 = vadd.f32 %v846_v56, %v838_v10  ;;  %v1038_v10 = vld [vmem:[%s2551_s4 + $0x18] sm:$0xff] }
 0x48b   :  { %v849_v26 = vadd.f32 %v845_v60, %v837_v39  ;;  %v1583_v57 = vpop.f32.mrb[16].mxu0  ;;  %v1686_v17 = vpack.c.bf16 %v1038_v10, %v1037_v42  ;;  %v1164_v39 = vld [vmem:[%s2552_s5] sm:$0xff] }
 0x48c   :  { %v840_v38 = vmul.f32 %v1583_v57, %v2085_v54  ;;  %v800_v12 = vpop.f32.mrb[17].mxu0 }
 0x48d   :  { %v839_v46 = vmul.f32 %v800_v12, %v2076_v51 }
 0x48e   :  { %v852_v18 = vadd.f32 %v848_v34, %v840_v38  ;;  %v1036_v34 = vld [vmem:[%s2551_s4 + $0x8] sm:$0xff]  ;;  %v1167_v38 = vld [vmem:[%s2552_s5 + $0x18] sm:$0xff] }
 0x48f   :  { %v851_v35 = vadd.f32 %v847_v36, %v839_v46  ;;  %v1586_v15 = vpop.f32.mrb[18].mxu0  ;;  %v1682_v36 = vpack.c.bf16 %v1036_v34, %v1035_v3  ;;  %v1168_v46 = vld [vmem:[%s2552_s5 + $0x20] sm:$0xff] }
 0x490   :  { %v842_v43 = vmul.f32 %v1586_v15, %v2099_v58  ;;  %v810_v52 = vpop.f32.mrb[19].mxu0 }
 0x491   :  { %v841_v6 = vmul.f32 %v810_v52, %v2091_v55  ;;  %v1420_v55 = vld [vmem:[%s2553_s6 + $0x3] ss:$0 sm:$0xff]  ;;  %1683 = vmatprep.subr.bf16.mxu1 %v1682_v36 }
 0x492   :  { %v854_v50 = vadd.f32 %v850_v48, %v842_v43  ;;  %v1165_v48 = vld [vmem:[%s2552_s5 + $0x8] sm:$0xff] }
 0x493   :  { %v853_v16 = vadd.f32 %v849_v26, %v841_v6  ;;  %v1589_v20 = vpop.f32.mrb[20].mxu0  ;;  %v1166_v26 = vld [vmem:[%s2552_s5 + $0x10] sm:$0xff]  ;;  %v1690_v57 = vpack.c.bf16 %v1165_v48, %v1164_v39 }
 0x494   :  { %v844_v47 = vmul.f32 %v1589_v20, %v2114_v62  ;;  %v820_v4 = vpop.f32.mrb[21].mxu0  ;;  %v1694_v12 = vpack.c.bf16 %v1167_v38, %v1166_v26 }
 0x495   :  { %v843_v21 = vmul.f32 %v820_v4, %v2105_v59  ;;  %1598 = vmatprep.mubr.msk.f32.mxu1 %vm58_vm0, %v853_v16  ;;  %1691 = vmatprep.subr.bf16.mxu0 %v1690_v57 }
 0x496   :  { %v856_v54 = vadd.f32 %v852_v18, %v844_v47  ;;  %1599 = vmatmul.mubr.msk.f32.vlgmr.msra.gmra.mrb[16].mxu1 %vm58_vm0, %v854_v50  ;;  %v1169_v18 = vld [vmem:[%s2552_s5 + $0x28] sm:$0xff]  ;;  %1693 = vmatpush3.bf16.msra.mxu0 %v1690_v57 }
 0x497   :  { %v855_v51 = vadd.f32 %v851_v35, %v843_v21  ;;  %1685 = vmatpush3.bf16.msra.mxu1 %v1682_v36  ;;  %1695 = vmatprep.subr.bf16.mxu0 %v1694_v12  ;;  %v1698_v35 = vpack.c.bf16 %v1169_v18, %v1168_v46 }
 0x498   :  { %1687 = vmatprep.subr.bf16.mxu1 %v1686_v17 }
 0x499   :  { %1601 = vmatprep.mubr.msk.f32.mxu1 %vm58_vm0, %v855_v51 }
 0x49a   :  { %1602 = vmatmul.mubr.msk.f32.gmra.mrb[18].mxu1 %vm58_vm0, %v856_v54  ;;  %1697 = vmatpush3.bf16.msra.mxu0 %v1694_v12 }
 0x49b   :  { %1689 = vmatpush3.bf16.msra.mxu1 %v1686_v17  ;;  %1699 = vmatprep.subr.bf16.mxu0 %v1698_v35 }
 0x49e   :  { %1701 = vmatpush3.bf16.msra.mxu0 %v1698_v35 }
 0x569   :  { %v1600_v58 = vpop.f32.mrb[16].mxu1 }
 0x56a   :  { %v949_v28 = vadd.f32 %v1600_v58, %v1420_v55  ;;  %v943_v62 = vpop.f32.mrb[17].mxu1 }
 0x56b   :  { %v944_v22 = vadd.f32 %v1420_v55, %v943_v62 }
 0x56c   :  { %v963_v59 = vadd.f32 %v949_v28, %v1967_v8  ;;  %v1425_v28 = vld [vmem:[%s2553_s6 + $0x4] ss:$0 sm:$0xff] }
 0x56d   :  { %v1603_v29 = vpop.f32.mrb[18].mxu1  ;;  %v962_v23 = vadd.f32 %v944_v22, %v1957_v5 }
 0x56e   :  { %v953_v63 = vpop.f32.mrb[19].mxu1  ;;  %v969_v24 = vsel %vm58_vm0, %v963_v59, 0.0  ;;  %v959_v49 = vadd.f32 %v1603_v29, %v1420_v55  ;;  %v1426_v29 = vld [vmem:[%s2553_s6 + $0x5] ss:$0 sm:$0xff] }
 0x56f   :  { %v954_v53 = vadd.f32 %v1420_v55, %v953_v63  ;;  %970 = vadd.xlane.f32.xlu1 %v969_v24  ;;  %v966_v14 = vsel %vm58_vm0, %v962_v23, 0.0 }
 0x570   :  { %967 = vadd.xlane.f32.xlu0 %v966_v14  ;;  %v965_v31 = vadd.f32 %v959_v49, %v1983_v11 }
 0x571   :  { %v964_v25 = vadd.f32 %v954_v53, %v1972_v9 }
 0x572   :  { %v975_v8 = vsel %vm58_vm0, %v965_v31, 0.0 }
 0x573   :  { %v972_v0 = vsel %vm58_vm0, %v964_v25, 0.0 }
 0x574   :  { %973 = vadd.xlane.f32.xlu1 %v972_v0 }
 0x578   :  { %976 = vadd.xlane.f32.xlu1 %v975_v8 }
 0x5fc   :  { %v971_v5 = vpop.xlane.xlu1 %970 }
 0x5fd   :  { %v980_v33 = vmul.f32 0.03125, %v971_v5  ;;  %v968_v30 = vpop.xlane.xlu0 %967 }
 0x5fe   :  { %v979_v37 = vmul.f32 0.03125, %v968_v30  ;;  %v1171_v30 = vld [vmem:[%s2552_s5 + $0x38] sm:$0xff] }
 0x5ff   :  { %v984_v41 = vsub.f32 %v963_v59, %v980_v33  ;;  %v1170_v33 = vld [vmem:[%s2552_s5 + $0x30] sm:$0xff] }
 0x600   :  { %v2394_v19 = vsub.f32 %v962_v23, %v979_v37  ;;  %v1702_v37 = vpack.c.bf16 %v1171_v30, %v1170_v33 }
 0x601   :  { %v974_v44 = vpop.xlane.xlu1 %973  ;;  %v988_v13 = vmul.f32 %v984_v41, %v984_v41 }
 0x602   :  { %v981_v45 = vmul.f32 0.03125, %v974_v44  ;;  %v987_v40 = vmul.f32 %v2394_v19, %v2394_v19  ;;  %1703 = vmatprep.subr.bf16.mxu0 %v1702_v37 }
 0x603   :  { %v994_v9 = vsel %vm58_vm0, %v988_v13, 0.0  ;;  %1705 = vmatpush3.bf16.msra.mxu0 %v1702_v37  ;;  %v1174_v13 = vld [vmem:[%s2552_s5 + $0x50] sm:$0xff] }
 0x604   :  { %v2399_v11 = vsub.f32 %v964_v25, %v981_v45  ;;  %995 = vadd.xlane.f32.xlu1 %v994_v9  ;;  %v991_v60 = vsel %vm58_vm0, %v987_v40, 0.0  ;;  %v1175_v45 = vld [vmem:[%s2552_s5 + $0x58] sm:$0xff]  ;;  %v1176_v40 = vld [vmem:[%s2552_s5 + $0x60] sm:$0xff] }
 0x605   :  { %v977_v32 = vpop.xlane.xlu1 %976  ;;  %v1710_v9 = vpack.c.bf16 %v1175_v45, %v1174_v13 }
 0x606   :  { %v982_v56 = vmul.f32 0.03125, %v977_v32  ;;  %v989_v27 = vmul.f32 %v2399_v11, %v2399_v11 }
 0x608   :  { %v2404_v61 = vsub.f32 %v965_v31, %v982_v56  ;;  %992 = vadd.xlane.f32.xlu1 %v991_v60  ;;  %v997_v1 = vsel %vm58_vm0, %v989_v27, 0.0  ;;  %v1178_v56 = vld [vmem:[%s2552_s5 + $0x70] sm:$0xff]  ;;  %v1179_v60 = vld [vmem:[%s2552_s5 + $0x78] sm:$0xff] }
 0x609   :  { %v1718_v27 = vpack.c.bf16 %v1179_v60, %v1178_v56 }
 0x60a   :  { %v990_v2 = vmul.f32 %v2404_v61, %v2404_v61 }
 0x60c   :  { %998 = vadd.xlane.f32.xlu1 %v997_v1  ;;  %v1000_v7 = vsel %vm58_vm0, %v990_v2, 0.0 }
 0x610   :  { %1001 = vadd.xlane.f32.xlu1 %v1000_v7 }
 0x691   :  { %v996_v15 = vpop.xlane.xlu1 %995 }
 0x692   :  { %v1004_v43 = vmul.f32 0.03125, %v996_v15 }
 0x694   :  { %v1008_v52 = vadd.f32 1e-05, %v1004_v43 }
 0x695   :  { %v993_v6 = vpop.xlane.xlu1 %992 }
 0x696   :  { %1803 = vrsqrt.f32 %v1008_v52  ;;  %v1003_v50 = vmul.f32 0.03125, %v993_v6 }
 0x698   :  { %v1007_v16 = vadd.f32 1e-05, %v1003_v50 }
 0x699   :  { %v999_v20 = vpop.xlane.xlu1 %998 }
 0x69a   :  { %1805 = vrsqrt.f32 %v1007_v16  ;;  %v1005_v47 = vmul.f32 0.03125, %v999_v20 }
 0x69c   :  { %v1009_v4 = vadd.f32 1e-05, %v1005_v47 }
 0x69d   :  { %v1002_v21 = vpop.xlane.xlu1 %1001 }
 0x69e   :  { %1807 = vrsqrt.f32 %v1009_v4  ;;  %v1006_v54 = vmul.f32 0.03125, %v1002_v21 }
 0x6a0   :  { %v1804_v51 = vpop.eup %1803  ;;  %v1010_v55 = vadd.f32 1e-05, %v1006_v54  ;;  %v1432_v54 = vld [vmem:[%s2553_s6 + $0x8] ss:$0 sm:$0xff] }
 0x6a1   :  { %v1016_v58 = vmul.f32 %v1804_v51, %v984_v41  ;;  %v1172_v41 = vld [vmem:[%s2552_s5 + $0x40] sm:$0xff] }
 0x6a2   :  { %1809 = vrsqrt.f32 %v1010_v55 }
 0x6a3   :  { %v1024_v59 = vmul.f32 %v1425_v28, %v1016_v58 }
 0x6a4   :  { %v1806_v62 = vpop.eup %1805 }
 0x6a5   :  { %v1015_v22 = vmul.f32 %v1806_v62, %v2394_v19  ;;  %v2450_v53 = vadd.f32 %v1426_v29, %v1024_v59  ;;  %v1173_v19 = vld [vmem:[%s2552_s5 + $0x48] sm:$0xff] }
 0x6a6   :  { %v1706_v44 = vpack.c.bf16 %v1173_v19, %v1172_v41 }
 0x6a7   :  { %v1023_v23 = vmul.f32 %v1425_v28, %v1015_v22 }
 0x6a8   :  { %v1808_v63 = vpop.eup %1807  ;;  %1707 = vmatprep.subr.bf16.mxu0 %v1706_v44 }
 0x6a9   :  { %v2447_v24 = vadd.f32 %v1426_v29, %v1023_v23  ;;  %v1017_v49 = vmul.f32 %v1808_v63, %v2399_v11  ;;  %1709 = vmatpush3.bf16.msra.mxu0 %v1706_v44  ;;  %v1177_v11 = vld [vmem:[%s2552_s5 + $0x68] sm:$0xff] }
 0x6aa   :  { %1711 = vmatprep.subr.bf16.mxu0 %v1710_v9  ;;  %v1714_v32 = vpack.c.bf16 %v1177_v11, %v1176_v40 }
 0x6ab   :  { %1612 = vmatprep.mubr.msk.f32.mxu1 %vm58_vm0, %v2447_v24  ;;  %v1025_v14 = vmul.f32 %v1425_v28, %v1017_v49 }
 0x6ac   :  { %v1810_v25 = vpop.eup %1809  ;;  %1613 = vmatmul.mubr.msk.f32.vlgmr.msra.gmra.mrb[20].mxu1 %vm58_vm0, %v2450_v53 }
 0x6ad   :  { %v2456_v0 = vadd.f32 %v1426_v29, %v1025_v14  ;;  %v1018_v31 = vmul.f32 %v1810_v25, %v2404_v61  ;;  %1713 = vmatpush3.bf16.msra.mxu0 %v1710_v9  ;;  %v1427_v61 = vld [vmem:[%s2554_s7] ss:$0 sm:$0xff] }
 0x6ae   :  { %1715 = vmatprep.subr.bf16.mxu0 %v1714_v32 }
 0x6af   :  { %1615 = vmatprep.mubr.msk.f32.mxu1 %vm58_vm0, %v2456_v0  ;;  %v1026_v8 = vmul.f32 %v1425_v28, %v1018_v31 }
 0x6b1   :  { %v2461_v5 = vadd.f32 %v1426_v29, %v1026_v8  ;;  %1717 = vmatpush3.bf16.msra.mxu0 %v1714_v32 }
 0x6b2   :  { %1719 = vmatprep.subr.bf16.mxu0 %v1718_v27 }
 0x6b3   :  { %1616 = vmatmul.mubr.msk.f32.gmra.mrb[22].mxu1 %vm58_vm0, %v2461_v5 }
 0x6b5   :  { %1721 = vmatpush3.bf16.msra.mxu0 %v1718_v27 }
 0x77f   :  { %v1614_v1 = vpop.f32.mrb[20].mxu1 }
 0x780   :  { %v1130_v2 = vadd.f32 %v1614_v1, %v1427_v61  ;;  %v1124_v7 = vpop.f32.mrb[21].mxu1 }
 0x781   :  { %v1125_v3 = vadd.f32 %v1427_v61, %v1124_v7 }
 0x782   :  { %v1149_v34 = vmul.f32 0.70710677, %v1130_v2  ;;  %v1144_v35 = vmul.f32 0.5, %v1130_v2 }
 0x783   :  { %v1148_v36 = vmul.f32 0.70710677, %v1125_v3  ;;  %v1143_v46 = vmul.f32 0.5, %v1125_v3 }
 0x784   :  { %1811 = verf.f32 %v1149_v34 }
 0x785   :  { %1813 = verf.f32 %v1148_v36 }
 0x786   :  { %v1617_v42 = vpop.f32.mrb[22].mxu1 }
 0x787   :  { %v1140_v10 = vadd.f32 %v1617_v42, %v1427_v61  ;;  %v1134_v17 = vpop.f32.mrb[23].mxu1 }
 0x788   :  { %v1135_v39 = vadd.f32 %v1427_v61, %v1134_v17 }
 0x789   :  { %v1151_v48 = vmul.f32 0.70710677, %v1140_v10  ;;  %v1146_v47 = vmul.f32 0.5, %v1140_v10 }
 0x78a   :  { %v1150_v26 = vmul.f32 0.70710677, %v1135_v39  ;;  %v1145_v16 = vmul.f32 0.5, %v1135_v39 }
 0x78b   :  { %1815 = verf.f32 %v1151_v48 }
 0x78c   :  { %1817 = verf.f32 %v1150_v26 }
 0x78e   :  { %v1812_v57 = vpop.eup %1811 }
 0x78f   :  { %v1814_v38 = vpop.eup %1813  ;;  %v1157_v12 = vadd.f32 1.0, %v1812_v57 }
 0x790   :  { %v1156_v18 = vadd.f32 1.0, %v1814_v38 }
 0x791   :  { %v1161_v43 = vmul.f32 %v1157_v12, %v1144_v35  ;;  %v1433_v12 = vld [vmem:[%s2553_s6 + $0x6] ss:$0 sm:$0xff]  ;;  %v1434_v35 = vld [vmem:[%s2553_s6 + $0x7] ss:$0 sm:$0xff] }
 0x792   :  { %v1160_v15 = vmul.f32 %v1156_v18, %v1143_v46 }
 0x794   :  { %1650 = vmatprep.mubr.f32.mxu0 %v1160_v15 }
 0x795   :  { %v1816_v52 = vpop.eup %1815  ;;  %1651 = vmatmul.mubr.f32.vlgmr.msra.gmra.mrb[22].mxu0 %v1161_v43 }
 0x796   :  { %v1818_v6 = vpop.eup %1817  ;;  %v1159_v50 = vadd.f32 1.0, %v1816_v52 }
 0x797   :  { %v1158_v20 = vadd.f32 1.0, %v1818_v6 }
 0x798   :  { %v1163_v21 = vmul.f32 %v1159_v50, %v1146_v47 }
 0x799   :  { %v1162_v4 = vmul.f32 %v1158_v20, %v1145_v16 }
 0x79b   :  { %1653 = vmatprep.mubr.f32.mxu0 %v1162_v4 }
 0x79c   :  { %1654 = vmatmul.mubr.f32.gmra.mrb[24].mxu0 %v1163_v21 }
 0x868   :  { %v1652_v51 = vpop.f32.mrb[22].mxu0 }
 0x869   :  { %v1256_v55 = vadd.f32 %v1652_v51, %v1432_v54  ;;  %v1250_v58 = vpop.f32.mrb[23].mxu0 }
 0x86a   :  { %v1251_v28 = vadd.f32 %v1432_v54, %v1250_v58 }
 0x86b   :  { %v1270_v62 = vadd.f32 %v1256_v55, %v2450_v53 }
 0x86c   :  { %v1269_v22 = vadd.f32 %v1251_v28, %v2447_v24 }
 0x86d   :  { %v1276_v59 = vsel %vm58_vm0, %v1270_v62, 0.0 }
 0x86e   :  { %1277 = vadd.xlane.f32.xlu0 %v1276_v59  ;;  %v1273_v29 = vsel %vm58_vm0, %v1269_v22, 0.0 }
 0x86f   :  { %1274 = vadd.xlane.f32.xlu1 %v1273_v29  ;;  %v1655_v23 = vpop.f32.mrb[24].mxu0 }
 0x870   :  { %v1266_v63 = vadd.f32 %v1655_v23, %v1432_v54  ;;  %v1260_v49 = vpop.f32.mrb[25].mxu0 }
 0x871   :  { %v1261_v14 = vadd.f32 %v1432_v54, %v1260_v49 }
 0x872   :  { %v1272_v25 = vadd.f32 %v1266_v63, %v2461_v5 }
 0x873   :  { %v1271_v31 = vadd.f32 %v1261_v14, %v2456_v0 }
 0x874   :  { %v1282_v8 = vsel %vm58_vm0, %v1272_v25, 0.0 }
 0x875   :  { %1283 = vadd.xlane.f32.xlu0 %v1282_v8  ;;  %v1279_v53 = vsel %vm58_vm0, %v1271_v31, 0.0 }
 0x876   :  { %1280 = vadd.xlane.f32.xlu1 %v1279_v53 }
 0x8fb   :  { %v1278_v24 = vpop.xlane.xlu0 %1277 }
 0x8fc   :  { %v1286_v33 = vmul.f32 0.03125, %v1278_v24  ;;  %v1275_v30 = vpop.xlane.xlu1 %1274 }
 0x8fd   :  { %v1285_v37 = vmul.f32 0.03125, %v1275_v30 }
 0x8fe   :  { %v1290_v41 = vsub.f32 %v1270_v62, %v1286_v33 }
 0x8ff   :  { %v1289_v19 = vsub.f32 %v1269_v22, %v1285_v37 }
 0x900   :  { %v1294_v44 = vmul.f32 %v1290_v41, %v1290_v41 }
 0x901   :  { %v1293_v13 = vmul.f32 %v1289_v19, %v1289_v19 }
 0x902   :  { %v1284_v45 = vpop.xlane.xlu0 %1283  ;;  %v1300_v9 = vsel %vm58_vm0, %v1294_v44, 0.0 }
 0x903   :  { %v1288_v5 = vmul.f32 0.03125, %v1284_v45  ;;  %1301 = vadd.xlane.f32.xlu0 %v1300_v9  ;;  %v1281_v0 = vpop.xlane.xlu1 %1280  ;;  %v1297_v40 = vsel %vm58_vm0, %v1293_v13, 0.0 }
 0x904   :  { %v1287_v11 = vmul.f32 0.03125, %v1281_v0  ;;  %1298 = vadd.xlane.f32.xlu1 %v1297_v40 }
 0x905   :  { %v1292_v32 = vsub.f32 %v1272_v25, %v1288_v5 }
 0x906   :  { %v1291_v56 = vsub.f32 %v1271_v31, %v1287_v11 }
 0x907   :  { %v1296_v60 = vmul.f32 %v1292_v32, %v1292_v32 }
 0x908   :  { %v1295_v27 = vmul.f32 %v1291_v56, %v1291_v56 }
 0x909   :  { %v1306_v61 = vsel %vm58_vm0, %v1296_v60, 0.0 }
 0x90a   :  { %1307 = vadd.xlane.f32.xlu0 %v1306_v61  ;;  %v1303_v1 = vsel %vm58_vm0, %v1295_v27, 0.0 }
 0x90b   :  { %1304 = vadd.xlane.f32.xlu1 %v1303_v1 }
 0x990   :  { %v1302_v2 = vpop.xlane.xlu0 %1301 }
 0x991   :  { %v1310_v7 = vmul.f32 0.03125, %v1302_v2  ;;  %v1299_v3 = vpop.xlane.xlu1 %1298 }
 0x992   :  { %v1309_v34 = vmul.f32 0.03125, %v1299_v3 }
 0x993   :  { %v1314_v36 = vadd.f32 1e-05, %v1310_v7 }
 0x994   :  { %v1313_v42 = vadd.f32 1e-05, %v1309_v34 }
 0x995   :  { %1819 = vrsqrt.f32 %v1314_v36 }
 0x996   :  { %1821 = vrsqrt.f32 %v1313_v42 }
 0x997   :  { %v1308_v10 = vpop.xlane.xlu0 %1307 }
 0x998   :  { %v1312_v17 = vmul.f32 0.03125, %v1308_v10  ;;  %v1305_v39 = vpop.xlane.xlu1 %1304 }
 0x999   :  { %v1311_v48 = vmul.f32 0.03125, %v1305_v39 }
 0x99a   :  { %v1316_v26 = vadd.f32 1e-05, %v1312_v17 }
 0x99b   :  { %v1315_v57 = vadd.f32 1e-05, %v1311_v48 }
 0x99c   :  { %1823 = vrsqrt.f32 %v1316_v26 }
 0x99d   :  { %1825 = vrsqrt.f32 %v1315_v57 }
 0x99f   :  { %v1820_v38 = vpop.eup %1819 }
 0x9a0   :  { %v1822_v46 = vpop.eup %1821  ;;  %v1322_v18 = vmul.f32 %v1820_v38, %v1290_v41 }
 0x9a1   :  { %v1321_v15 = vmul.f32 %v1822_v46, %v1289_v19 }
 0x9a2   :  { %v1330_v43 = vmul.f32 %v1433_v12, %v1322_v18 }
 0x9a3   :  { %v1329_v52 = vmul.f32 %v1433_v12, %v1321_v15 }
 0x9a4   :  { %v1338_v6 = vadd.f32 %v1434_v35, %v1330_v43 }
 0x9a5   :  { %v1337_v50 = vadd.f32 %v1434_v35, %v1329_v52 }
 0x9a6   :  { %v1824_v16 = vpop.eup %1823  ;;  %1342 = vst.msk [vmem:[#allocation2 + $0x8] sm:$0xff] %vm58_vm0, %v1338_v6 }
 0x9a7   :  { %v1826_v20 = vpop.eup %1825  ;;  %v1324_v47 = vmul.f32 %v1824_v16, %v1292_v32  ;;  %1341 = vst.msk [vmem:[#allocation2] sm:$0xff] %vm58_vm0, %v1337_v50 }
 0x9a8   :  { %v1323_v4 = vmul.f32 %v1826_v20, %v1291_v56 }
 0x9a9   :  { %1838 = shalt.err (!%p1835_p4)
}
 0x9aa   :  { %s1839_s26 = scalar_lea.hbm %s2557_s10, 256 }
 0x9ab   :  { %p1840_p5 = scmp.ne.s32.totalorder %s2557_s10, %s1839_s26  ;;  %p1843_p6 = scmp.lt.u32.totalorder %s1839_s26, %s2557_s10 }
 0x9ad   :  { %p1845_p7 = pnand %p1843_p6, %p1840_p5 }
 0x9af   :  { %1848 = shalt.err (!%p1845_p7)
}
 0x9b0   :  { %s1879_s8 = smov 128   ;;  %s1880_s30 = smov 8   ;;  %v1332_v21 = vmul.f32 %v1433_v12, %v1324_v47  ;;  %v1331_v54 = vmul.f32 %v1433_v12, %v1323_v4 }
 0x9b1   :  { %1356 = dma.vmem_to_hbm [thread:$0]  %s1351_s23, 256, %s2557_s10, [#allocation3], %s1879_s8, %s1879_s8, %s1880_s30  }
 0x9b2   :  { %s1881_s14 = smov [#allocation4]   ;;  %v1340_v51 = vadd.f32 %v1434_v35, %v1332_v21  ;;  %v1339_v55 = vadd.f32 %v1434_v35, %v1331_v54 }
 0x9b3   :  { %s1362_s15 = sshll.u32 %s1881_s14, 4  ;;  %s1363_s15 = int_to_ptr.vmem [resolvable:$true] %s1362_s15 }
 0x9b4   :  { %1344 = vst.msk [vmem:[#allocation4 + $0x8] sm:$0xff] %vm58_vm0, %v1340_v51  ;;  %1343 = vst.msk [vmem:[#allocation4] sm:$0xff] %vm58_vm0, %v1339_v55  ;;  %s1849_s0 = scalar_lea.vmem %s1363_s15, 256  ;;  %p1854_p9 = scmp.lt.s32.totalorder %s1363_s15, %s1363_s15 }
 0x9b5   :  { %p1850_p8 = scmp.ne.s32.totalorder %s1363_s15, %s1849_s0  ;;  %p1855_p10 = scmp.lt.s32.totalorder %s1849_s0, %s1849_s0 }
 0x9b7   :  { %p1856_p11 = por %p1855_p10, %p1854_p9 }
 0x9b9   :  { %p1857_p12 = pnand %p1856_p11, %p1850_p8 }
 0x9bb   :  { %1860 = shalt.err (!%p1857_p12)
}
 0x9bc   :  { %s1861_s4 = scalar_lea.hbm %s2558_s11, 256 }
 0x9bd   :  { %p1862_p13 = scmp.ne.s32.totalorder %s2558_s11, %s1861_s4  ;;  %p1865_p0 = scmp.lt.u32.totalorder %s1861_s4, %s2558_s11 }
 0x9bf   :  { %p1867_p1 = pnand %p1865_p0, %p1862_p13 }
 0x9c1   :  { %1870 = shalt.err (!%p1867_p1)
}
 0x9c2   :  { %1368 = dma.vmem_to_hbm [thread:$0]  %s1363_s15, 256, %s2558_s11, [#allocation5], %s1879_s8, %s1879_s8, %s1880_s30  }
 0x9c3   :  { %1871 = dma.done.wait [#allocation3], 256  }
 0x9c4   :  { %1872 = vsyncadd [#allocation3], 4294967040 }
 0x9c5   :  { %1873 = dma.done.wait [#allocation5], 256  }
 0x9c6   :  { %1874 = vsyncadd [#allocation5], 4294967040 }
 0x9c7   :  { %1375 = vsyncpa [#allocation3], 1 }
 0x9c8   :  { %1376 = vsyncpa [#allocation5], 1 }

</bundles_post_ra>
